<compile_context>
chip_gen: v7x
topology: tpu7x:2x2x1
jax: 0.10.0
libtpu: 0.0.40
codegen_flags: <defaults>
</compile_context>

<pallas_src>
import jax
import jax.numpy as jnp
from jax.experimental import pallas as pl
from jax.experimental.pallas import tpu as pltpu


def _round_up(x, m):
    return ((x + m - 1) // m) * m


def _multitask_forward_kernel(
    x_ref, t_ref,
    w1_ref, b1_ref, w2_ref, b2_ref, w3_ref, b3_ref,                   # shared encoder h
    wy1h_ref, wy1t_ref, by1_ref, wy2_ref, by2_ref, wy3_ref, by3_ref,  # head_Y
    out_ref,
):
    cd = w1_ref.dtype  # matmul-operand dtype (bf16 or f32); accumulation is f32

    # ---- shared encoder h(X): Linear+ReLU, Linear+ReLU, Linear ----
    x = x_ref[...].astype(cd)  # in-kernel cast (VPU); X is DMA'd in its native dtype
    h = jnp.dot(x, w1_ref[...], preferred_element_type=jnp.float32) + b1_ref[...]
    h = jnp.maximum(h, 0.0)
    h = jnp.dot(h.astype(cd), w2_ref[...], preferred_element_type=jnp.float32) + b2_ref[...]
    h = jnp.maximum(h, 0.0)
    h_x = jnp.dot(h.astype(cd), w3_ref[...], preferred_element_type=jnp.float32) + b3_ref[...]

    # ---- head_Y(concat([h_x, one_hot(T)])) ----
    # Treatment contribution = row T[i] of wy1_t (the one-hot matmul is folded away).
    t = t_ref[...]                               # (TM, 1) int32
    k = wy1t_ref.shape[0]
    if k <= 8:
        # Select-and-accumulate over the small static k rows (pure VPU work),
        # seeded with by1 so no separate bias add is needed.
        wy1t = wy1t_ref[...].astype(jnp.float32)         # (k, n1)
        t_rows = by1_ref[...] + jnp.where(t == 0, wy1t[0:1, :], 0.0)
        for j in range(1, k):
            t_rows = t_rows + jnp.where(t == j, wy1t[j:j + 1, :], 0.0)
    else:
        # Larger k: one tiny MXU pass instead of k VALU selects.
        ids = jax.lax.broadcasted_iota(jnp.int32, (t.shape[0], k), 1)
        onehot = (ids == t).astype(cd)
        t_rows = (jnp.dot(onehot, wy1t_ref[...].astype(cd),
                          preferred_element_type=jnp.float32) + by1_ref[...])

    z = jnp.dot(h_x.astype(cd), wy1h_ref[...], preferred_element_type=jnp.float32) + t_rows
    z = jnp.maximum(z, 0.0)
    z = jnp.dot(z.astype(cd), wy2_ref[...], preferred_element_type=jnp.float32) + by2_ref[...]
    z = jnp.maximum(z, 0.0)
    y = jnp.dot(z.astype(cd), wy3_ref[...], preferred_element_type=jnp.float32) + by3_ref[...]

    out_ref[...] = y.astype(out_ref.dtype)


def multitask_forward(X, T, prepped, *, max_tm=1024):
    """Fused Pallas forward: Y_hat = head_Y(cat([h(X), one_hot(T)]))."""
    B, d_x = X.shape
    d_y = prepped["wy3"].shape[1]

    # Batch tile: multiple of 8 sublanes, as large as useful (per-step overhead ~0.35us),
    # but try for >= 2 grid steps so both v7x TensorCores get work.
    tm = min(max_tm, _round_up(B, 8))
    if B > 8 and pl.cdiv(B, tm) < 2:
        tm = max(8, _round_up(-(-B // 2), 8))
    grid = (pl.cdiv(B, tm),)

    # No jnp.pad of X/T: Pallas handles the ragged last tile (rows are independent and
    # out-of-bounds rows are never written back to HBM).
    t_in = T.astype(jnp.int32).reshape(B, 1)

    weights = (
        prepped["w1"], prepped["b1"], prepped["w2"], prepped["b2"],
        prepped["w3"], prepped["b3"],
        prepped["wy1_h"], prepped["wy1_t"], prepped["by1"],
        prepped["wy2"], prepped["by2"], prepped["wy3"], prepped["by3"],
    )
    # X / T / out tiled over the batch; weights resident (constant index_map).
    in_specs = [
        pl.BlockSpec((tm, d_x), lambda i: (i, 0)),
        pl.BlockSpec((tm, 1), lambda i: (i, 0)),
    ] + [pl.BlockSpec(w.shape, lambda i: (0, 0)) for w in weights]
    out_spec = pl.BlockSpec((tm, d_y), lambda i: (i, 0))  # unpadded: d_y == full array dim

    out = pl.pallas_call(
        _multitask_forward_kernel,
        out_shape=jax.ShapeDtypeStruct((B, d_y), jnp.float32),
        grid_spec=pltpu.PrefetchScalarGridSpec(
            num_scalar_prefetch=0,
            grid=grid,
            in_specs=in_specs,
            out_specs=out_spec,
        ),
        compiler_params=pltpu.CompilerParams(
            dimension_semantics=("parallel",),   # v7x: shard batch tiles across TCs
            vmem_limit_bytes=32 * 1024 * 1024,   # plenty for tiles + resident weights
        ),
    )(X, t_in, *weights)
    return out


def init_params(key, d_x, d_y, k, h_dim, hidden_dims):
    """Deterministic synthetic parameter init (He-like), f32, stored [in, out]."""
    def linear(key, fan_in, fan_out):
        kw, kb = jax.random.split(key)
        w = jax.random.normal(kw, (fan_in, fan_out), jnp.float32) * (2.0 / fan_in) ** 0.5
        b = jax.random.normal(kb, (1, fan_out), jnp.float32) * 0.01
        return w, b

    keys = jax.random.split(key, 6)
    h1, h2 = hidden_dims
    p = {}
    p["w1"], p["b1"] = linear(keys[0], d_x, h1)          # encoder: d_x->h1->h2->h_dim
    p["w2"], p["b2"] = linear(keys[1], h1, h2)
    p["w3"], p["b3"] = linear(keys[2], h2, h_dim)
    p["wy1"], p["by1"] = linear(keys[3], h_dim + k, h1)  # head_Y: (h_dim+k)->h1->h2->d_y
    p["wy2"], p["by2"] = linear(keys[4], h1, h2)
    p["wy3"], p["by3"] = linear(keys[5], h2, d_y)
    return p


def prepare_params(raw, *, h_dim, use_bf16=True):
    """One-time prep: split wy1 into (h, treatment) blocks and cast matmul operands to
    bf16 (biases and the tiny treatment block stay f32). No output padding."""
    cd = jnp.bfloat16 if use_bf16 else jnp.float32
    return {
        "w1": raw["w1"].astype(cd), "b1": raw["b1"],
        "w2": raw["w2"].astype(cd), "b2": raw["b2"],
        "w3": raw["w3"].astype(cd), "b3": raw["b3"],
        "wy1_h": raw["wy1"][:h_dim, :].astype(cd),
        "wy1_t": raw["wy1"][h_dim:, :].astype(jnp.float32),
        "by1": raw["by1"],
        "wy2": raw["wy2"].astype(cd), "by2": raw["by2"],
        "wy3": raw["wy3"].astype(cd), "by3": raw["by3"],
    }


def reference_forward_f32(X, T, raw, k):
    """Pure-JAX f32 reference mirroring PyTorch MultiTask.forward exactly."""
    t1h = jax.nn.one_hot(T, k, dtype=jnp.float32)
    h = jnp.maximum(X @ raw["w1"] + raw["b1"], 0.0)
    h = jnp.maximum(h @ raw["w2"] + raw["b2"], 0.0)
    h_x = h @ raw["w3"] + raw["b3"]
    z = jnp.concatenate([h_x, t1h], axis=-1)
    z = jnp.maximum(z @ raw["wy1"] + raw["by1"], 0.0)
    z = jnp.maximum(z @ raw["wy2"] + raw["by2"], 0.0)
    return z @ raw["wy3"] + raw["by3"]


def reference_forward_matched(X, T, prepped):
    """Pure-JAX reference applying the exact dtype/cast sequence the kernel uses."""
    cd = prepped["w1"].dtype
    f32 = jnp.float32
    h = jnp.maximum(jnp.dot(X.astype(cd), prepped["w1"], preferred_element_type=f32) + prepped["b1"], 0.0)
    h = jnp.maximum(jnp.dot(h.astype(cd), prepped["w2"], preferred_element_type=f32) + prepped["b2"], 0.0)
    h_x = jnp.dot(h.astype(cd), prepped["w3"], preferred_element_type=f32) + prepped["b3"]
    t_rows = prepped["wy1_t"][T.astype(jnp.int32)]
    z = jnp.dot(h_x.astype(cd), prepped["wy1_h"], preferred_element_type=f32) + t_rows + prepped["by1"]
    z = jnp.maximum(z, 0.0)
    z = jnp.maximum(jnp.dot(z.astype(cd), prepped["wy2"], preferred_element_type=f32) + prepped["by2"], 0.0)
    return jnp.dot(z.astype(cd), prepped["wy3"], preferred_element_type=f32) + prepped["by3"]


if __name__ == "__main__":
    # Small shapes consistent with the module: X:[B, d_x], T:[B] int in [0, k).
    # B deliberately not a multiple of 8 to exercise the ragged (partial) batch tile.
    B, d_x, d_y, k, h_dim = 10, 16, 4, 3, 32
    hidden_dims = (64, 64)

    key = jax.random.PRNGKey(0)
    k_param, k_x, k_t = jax.random.split(key, 3)
    raw = init_params(k_param, d_x, d_y, k, h_dim, hidden_dims)
    X = jax.random.normal(k_x, (B, d_x), jnp.float32)
    T = jax.random.randint(k_t, (B,), 0, k)

    # 1) f32-operand path: must match the PyTorch-equivalent reference tightly.
    prepped_f32 = prepare_params(raw, h_dim=h_dim, use_bf16=False)
    y_f32 = jax.block_until_ready(multitask_forward(X, T, prepped_f32))
    y_ref = reference_forward_f32(X, T, raw, k)
    assert y_f32.shape == (B, d_y)
    assert jnp.allclose(y_f32, y_ref, atol=1e-4, rtol=1e-4)

    # 2) bf16-operand / f32-accumulate path (MXU-friendly on v6e/v7x): matches a
    #    reference that applies the identical casts.
    prepped_bf16 = prepare_params(raw, h_dim=h_dim, use_bf16=True)
    y_bf16 = jax.block_until_ready(multitask_forward(X, T, prepped_bf16))
    y_ref_bf16 = reference_forward_matched(X, T, prepped_bf16)
    assert y_bf16.shape == (B, d_y)
    assert jnp.allclose(y_bf16, y_ref_bf16, atol=1e-3, rtol=1e-3)

    print("KERNEL_OK")
</pallas_src>

<mosaic_0001>
module attributes {stable_mosaic.version = 11 : i64} {
  func.func @_multitask_forward_kernel(%arg0: i32, %arg1: memref<8x16xf32, #tpu.memory_space<vmem>>, %arg2: memref<8x1xi32, #tpu.memory_space<vmem>>, %arg3: memref<16x64xf32, #tpu.memory_space<vmem>>, %arg4: memref<1x64xf32, #tpu.memory_space<vmem>>, %arg5: memref<64x64xf32, #tpu.memory_space<vmem>>, %arg6: memref<1x64xf32, #tpu.memory_space<vmem>>, %arg7: memref<64x32xf32, #tpu.memory_space<vmem>>, %arg8: memref<1x32xf32, #tpu.memory_space<vmem>>, %arg9: memref<32x64xf32, #tpu.memory_space<vmem>>, %arg10: memref<3x64xf32, #tpu.memory_space<vmem>>, %arg11: memref<1x64xf32, #tpu.memory_space<vmem>>, %arg12: memref<64x64xf32, #tpu.memory_space<vmem>>, %arg13: memref<1x64xf32, #tpu.memory_space<vmem>>, %arg14: memref<64x4xf32, #tpu.memory_space<vmem>>, %arg15: memref<1x4xf32, #tpu.memory_space<vmem>>, %arg16: memref<8x4xf32, #tpu.memory_space<vmem>>) attributes {dimension_semantics = [#tpu.dimension_semantics<parallel>], iteration_bounds = array<i64: 2>, scalar_prefetch = 0 : i64, scratch_operands = 0 : i64, tpu.core_type = #tpu.core_type<tc>, window_params = [{transform_indices = @transform_0, window_bounds = array<i64: 8, 16>}, {transform_indices = @transform_1, window_bounds = array<i64: 8, 1>}, {pipeline_mode = #tpu.pipeline_mode<synchronous>, transform_indices = @transform_2, window_bounds = array<i64: 16, 64>}, {pipeline_mode = #tpu.pipeline_mode<synchronous>, transform_indices = @transform_3, window_bounds = array<i64: 1, 64>}, {pipeline_mode = #tpu.pipeline_mode<synchronous>, transform_indices = @transform_4, window_bounds = array<i64: 64, 64>}, {pipeline_mode = #tpu.pipeline_mode<synchronous>, transform_indices = @transform_5, window_bounds = array<i64: 1, 64>}, {pipeline_mode = #tpu.pipeline_mode<synchronous>, transform_indices = @transform_6, window_bounds = array<i64: 64, 32>}, {pipeline_mode = #tpu.pipeline_mode<synchronous>, transform_indices = @transform_7, window_bounds = array<i64: 1, 32>}, {pipeline_mode = #tpu.pipeline_mode<synchronous>, transform_indices = @transform_8, window_bounds = array<i64: 32, 64>}, {pipeline_mode = #tpu.pipeline_mode<synchronous>, transform_indices = @transform_9, window_bounds = array<i64: 3, 64>}, {pipeline_mode = #tpu.pipeline_mode<synchronous>, transform_indices = @transform_10, window_bounds = array<i64: 1, 64>}, {pipeline_mode = #tpu.pipeline_mode<synchronous>, transform_indices = @transform_11, window_bounds = array<i64: 64, 64>}, {pipeline_mode = #tpu.pipeline_mode<synchronous>, transform_indices = @transform_12, window_bounds = array<i64: 1, 64>}, {pipeline_mode = #tpu.pipeline_mode<synchronous>, transform_indices = @transform_13, window_bounds = array<i64: 64, 4>}, {pipeline_mode = #tpu.pipeline_mode<synchronous>, transform_indices = @transform_14, window_bounds = array<i64: 1, 4>}, {transform_indices = @transform_15, window_bounds = array<i64: 8, 4>}]} {
    %c0 = arith.constant 0 : index
    %c0_0 = arith.constant 0 : index
    %0 = vector.load %arg1[%c0, %c0_0] : memref<8x16xf32, #tpu.memory_space<vmem>>, vector<8x16xf32>
    %c0_1 = arith.constant 0 : index
    %c0_2 = arith.constant 0 : index
    %1 = vector.load %arg3[%c0_1, %c0_2] : memref<16x64xf32, #tpu.memory_space<vmem>>, vector<16x64xf32>
    %cst = arith.constant dense<0.000000e+00> : vector<8x64xf32>
    %2 = tpu.matmul %0, %1, %cst {dimension_numbers = #tpu.dot_dimension_numbers<[1], [0], [0], [1], [0, 0, 1, 1], [], []>} : vector<8x16xf32>, vector<16x64xf32>, vector<8x64xf32> -> vector<8x64xf32>
    %c0_3 = arith.constant 0 : index
    %c0_4 = arith.constant 0 : index
    %3 = vector.load %arg4[%c0_3, %c0_4] : memref<1x64xf32, #tpu.memory_space<vmem>>, vector<1x64xf32>
    %4 = vector.broadcast %3 : vector<1x64xf32> to vector<8x64xf32>
    %5 = arith.addf %2, %4 : vector<8x64xf32>
    %cst_5 = arith.constant 0.000000e+00 : f32
    %6 = vector.broadcast %cst_5 : f32 to vector<8x64xf32>
    %7 = arith.maximumf %5, %6 : vector<8x64xf32>
    %c0_6 = arith.constant 0 : index
    %c0_7 = arith.constant 0 : index
    %8 = vector.load %arg5[%c0_6, %c0_7] : memref<64x64xf32, #tpu.memory_space<vmem>>, vector<64x64xf32>
    %cst_8 = arith.constant dense<0.000000e+00> : vector<8x64xf32>
    %9 = tpu.matmul %7, %8, %cst_8 {dimension_numbers = #tpu.dot_dimension_numbers<[1], [0], [0], [1], [0, 0, 1, 1], [], []>} : vector<8x64xf32>, vector<64x64xf32>, vector<8x64xf32> -> vector<8x64xf32>
    %c0_9 = arith.constant 0 : index
    %c0_10 = arith.constant 0 : index
    %10 = vector.load %arg6[%c0_9, %c0_10] : memref<1x64xf32, #tpu.memory_space<vmem>>, vector<1x64xf32>
    %11 = vector.broadcast %10 : vector<1x64xf32> to vector<8x64xf32>
    %12 = arith.addf %9, %11 : vector<8x64xf32>
    %cst_11 = arith.constant 0.000000e+00 : f32
    %13 = vector.broadcast %cst_11 : f32 to vector<8x64xf32>
    %14 = arith.maximumf %12, %13 : vector<8x64xf32>
    %c0_12 = arith.constant 0 : index
    %c0_13 = arith.constant 0 : index
    %15 = vector.load %arg7[%c0_12, %c0_13] : memref<64x32xf32, #tpu.memory_space<vmem>>, vector<64x32xf32>
    %cst_14 = arith.constant dense<0.000000e+00> : vector<8x32xf32>
    %16 = tpu.matmul %14, %15, %cst_14 {dimension_numbers = #tpu.dot_dimension_numbers<[1], [0], [0], [1], [0, 0, 1, 1], [], []>} : vector<8x64xf32>, vector<64x32xf32>, vector<8x32xf32> -> vector<8x32xf32>
    %c0_15 = arith.constant 0 : index
    %c0_16 = arith.constant 0 : index
    %17 = vector.load %arg8[%c0_15, %c0_16] : memref<1x32xf32, #tpu.memory_space<vmem>>, vector<1x32xf32>
    %18 = vector.broadcast %17 : vector<1x32xf32> to vector<8x32xf32>
    %19 = arith.addf %16, %18 : vector<8x32xf32>
    %c0_17 = arith.constant 0 : index
    %c0_18 = arith.constant 0 : index
    %20 = vector.load %arg2[%c0_17, %c0_18] : memref<8x1xi32, #tpu.memory_space<vmem>>, vector<8x1xi32>
    %c0_19 = arith.constant 0 : index
    %c0_20 = arith.constant 0 : index
    %21 = vector.load %arg10[%c0_19, %c0_20] : memref<3x64xf32, #tpu.memory_space<vmem>>, vector<3x64xf32>
    %c0_21 = arith.constant 0 : index
    %c0_22 = arith.constant 0 : index
    %22 = vector.load %arg11[%c0_21, %c0_22] : memref<1x64xf32, #tpu.memory_space<vmem>>, vector<1x64xf32>
    %c0_i32 = arith.constant 0 : i32
    %23 = vector.broadcast %c0_i32 : i32 to vector<8x1xi32>
    %24 = arith.cmpi eq, %20, %23 : vector<8x1xi32>
    %25 = vector.extract_strided_slice %21 {offsets = [0, 0], sizes = [1, 64], strides = [1, 1]} : vector<3x64xf32> to vector<1x64xf32>
    %cst_23 = arith.constant 0.000000e+00 : f32
    %26 = vector.shape_cast %24 : vector<8x1xi1> to vector<8x1xi1>
    %27 = vector.broadcast %26 : vector<8x1xi1> to vector<8x64xi1>
    %28 = vector.shape_cast %25 : vector<1x64xf32> to vector<1x64xf32>
    %29 = vector.broadcast %28 : vector<1x64xf32> to vector<8x64xf32>
    %30 = vector.broadcast %cst_23 : f32 to vector<8x64xf32>
    %31 = arith.select %27, %29, %30 : vector<8x64xi1>, vector<8x64xf32>
    %32 = vector.broadcast %22 : vector<1x64xf32> to vector<8x64xf32>
    %33 = arith.addf %32, %31 : vector<8x64xf32>
    %c1_i32 = arith.constant 1 : i32
    %34 = vector.broadcast %c1_i32 : i32 to vector<8x1xi32>
    %35 = arith.cmpi eq, %20, %34 : vector<8x1xi32>
    %36 = vector.extract_strided_slice %21 {offsets = [1, 0], sizes = [1, 64], strides = [1, 1]} : vector<3x64xf32> to vector<1x64xf32>
    %cst_24 = arith.constant 0.000000e+00 : f32
    %37 = vector.shape_cast %35 : vector<8x1xi1> to vector<8x1xi1>
    %38 = vector.broadcast %37 : vector<8x1xi1> to vector<8x64xi1>
    %39 = vector.shape_cast %36 : vector<1x64xf32> to vector<1x64xf32>
    %40 = vector.broadcast %39 : vector<1x64xf32> to vector<8x64xf32>
    %41 = vector.broadcast %cst_24 : f32 to vector<8x64xf32>
    %42 = arith.select %38, %40, %41 : vector<8x64xi1>, vector<8x64xf32>
    %43 = arith.addf %33, %42 : vector<8x64xf32>
    %c2_i32 = arith.constant 2 : i32
    %44 = vector.broadcast %c2_i32 : i32 to vector<8x1xi32>
    %45 = arith.cmpi eq, %20, %44 : vector<8x1xi32>
    %46 = vector.extract_strided_slice %21 {offsets = [2, 0], sizes = [1, 64], strides = [1, 1]} : vector<3x64xf32> to vector<1x64xf32>
    %cst_25 = arith.constant 0.000000e+00 : f32
    %47 = vector.shape_cast %45 : vector<8x1xi1> to vector<8x1xi1>
    %48 = vector.broadcast %47 : vector<8x1xi1> to vector<8x64xi1>
    %49 = vector.shape_cast %46 : vector<1x64xf32> to vector<1x64xf32>
    %50 = vector.broadcast %49 : vector<1x64xf32> to vector<8x64xf32>
    %51 = vector.broadcast %cst_25 : f32 to vector<8x64xf32>
    %52 = arith.select %48, %50, %51 : vector<8x64xi1>, vector<8x64xf32>
    %53 = arith.addf %43, %52 : vector<8x64xf32>
    %c0_26 = arith.constant 0 : index
    %c0_27 = arith.constant 0 : index
    %54 = vector.load %arg9[%c0_26, %c0_27] : memref<32x64xf32, #tpu.memory_space<vmem>>, vector<32x64xf32>
    %cst_28 = arith.constant dense<0.000000e+00> : vector<8x64xf32>
    %55 = tpu.matmul %19, %54, %cst_28 {dimension_numbers = #tpu.dot_dimension_numbers<[1], [0], [0], [1], [0, 0, 1, 1], [], []>} : vector<8x32xf32>, vector<32x64xf32>, vector<8x64xf32> -> vector<8x64xf32>
    %56 = arith.addf %55, %53 : vector<8x64xf32>
    %cst_29 = arith.constant 0.000000e+00 : f32
    %57 = vector.broadcast %cst_29 : f32 to vector<8x64xf32>
    %58 = arith.maximumf %56, %57 : vector<8x64xf32>
    %c0_30 = arith.constant 0 : index
    %c0_31 = arith.constant 0 : index
    %59 = vector.load %arg12[%c0_30, %c0_31] : memref<64x64xf32, #tpu.memory_space<vmem>>, vector<64x64xf32>
    %cst_32 = arith.constant dense<0.000000e+00> : vector<8x64xf32>
    %60 = tpu.matmul %58, %59, %cst_32 {dimension_numbers = #tpu.dot_dimension_numbers<[1], [0], [0], [1], [0, 0, 1, 1], [], []>} : vector<8x64xf32>, vector<64x64xf32>, vector<8x64xf32> -> vector<8x64xf32>
    %c0_33 = arith.constant 0 : index
    %c0_34 = arith.constant 0 : index
    %61 = vector.load %arg13[%c0_33, %c0_34] : memref<1x64xf32, #tpu.memory_space<vmem>>, vector<1x64xf32>
    %62 = vector.broadcast %61 : vector<1x64xf32> to vector<8x64xf32>
    %63 = arith.addf %60, %62 : vector<8x64xf32>
    %cst_35 = arith.constant 0.000000e+00 : f32
    %64 = vector.broadcast %cst_35 : f32 to vector<8x64xf32>
    %65 = arith.maximumf %63, %64 : vector<8x64xf32>
    %c0_36 = arith.constant 0 : index
    %c0_37 = arith.constant 0 : index
    %66 = vector.load %arg14[%c0_36, %c0_37] : memref<64x4xf32, #tpu.memory_space<vmem>>, vector<64x4xf32>
    %cst_38 = arith.constant dense<0.000000e+00> : vector<8x4xf32>
    %67 = tpu.matmul %65, %66, %cst_38 {dimension_numbers = #tpu.dot_dimension_numbers<[1], [0], [0], [1], [0, 0, 1, 1], [], []>} : vector<8x64xf32>, vector<64x4xf32>, vector<8x4xf32> -> vector<8x4xf32>
    %c0_39 = arith.constant 0 : index
    %c0_40 = arith.constant 0 : index
    %68 = vector.load %arg15[%c0_39, %c0_40] : memref<1x4xf32, #tpu.memory_space<vmem>>, vector<1x4xf32>
    %69 = vector.broadcast %68 : vector<1x4xf32> to vector<8x4xf32>
    %70 = arith.addf %67, %69 : vector<8x4xf32>
    %c0_41 = arith.constant 0 : index
    %c0_42 = arith.constant 0 : index
    %71 = vector.load %arg16[%c0_41, %c0_42] : memref<8x4xf32, #tpu.memory_space<vmem>>, vector<8x4xf32>
    tpu.vector_store %arg16[%c0_41, %c0_42], %70 {strides = array<i32>} : memref<8x4xf32, #tpu.memory_space<vmem>>, vector<8x4xf32>,
    return
  }
  func.func @transform_0(%arg0: i32) -> (i32, i32) {
    %c0_i32 = arith.constant 0 : i32
    %c0_i32_0 = arith.constant 0 : i32
    return %arg0, %c0_i32 : i32, i32
  }
  func.func @transform_1(%arg0: i32) -> (i32, i32) {
    %c0_i32 = arith.constant 0 : i32
    %c0_i32_0 = arith.constant 0 : i32
    return %arg0, %c0_i32 : i32, i32
  }
  func.func @transform_2(%arg0: i32) -> (i32, i32) {
    %c0_i32 = arith.constant 0 : i32
    %c0_i32_0 = arith.constant 0 : i32
    %c0_i32_1 = arith.constant 0 : i32
    return %c0_i32, %c0_i32_0 : i32, i32
  }
  func.func @transform_3(%arg0: i32) -> (i32, i32) {
    %c0_i32 = arith.constant 0 : i32
    %c0_i32_0 = arith.constant 0 : i32
    %c0_i32_1 = arith.constant 0 : i32
    return %c0_i32, %c0_i32_0 : i32, i32
  }
  func.func @transform_4(%arg0: i32) -> (i32, i32) {
    %c0_i32 = arith.constant 0 : i32
    %c0_i32_0 = arith.constant 0 : i32
    %c0_i32_1 = arith.constant 0 : i32
    return %c0_i32, %c0_i32_0 : i32, i32
  }
  func.func @transform_5(%arg0: i32) -> (i32, i32) {
    %c0_i32 = arith.constant 0 : i32
    %c0_i32_0 = arith.constant 0 : i32
    %c0_i32_1 = arith.constant 0 : i32
    return %c0_i32, %c0_i32_0 : i32, i32
  }
  func.func @transform_6(%arg0: i32) -> (i32, i32) {
    %c0_i32 = arith.constant 0 : i32
    %c0_i32_0 = arith.constant 0 : i32
    %c0_i32_1 = arith.constant 0 : i32
    return %c0_i32, %c0_i32_0 : i32, i32
  }
  func.func @transform_7(%arg0: i32) -> (i32, i32) {
    %c0_i32 = arith.constant 0 : i32
    %c0_i32_0 = arith.constant 0 : i32
    %c0_i32_1 = arith.constant 0 : i32
    return %c0_i32, %c0_i32_0 : i32, i32
  }
  func.func @transform_8(%arg0: i32) -> (i32, i32) {
    %c0_i32 = arith.constant 0 : i32
    %c0_i32_0 = arith.constant 0 : i32
    %c0_i32_1 = arith.constant 0 : i32
    return %c0_i32, %c0_i32_0 : i32, i32
  }
  func.func @transform_9(%arg0: i32) -> (i32, i32) {
    %c0_i32 = arith.constant 0 : i32
    %c0_i32_0 = arith.constant 0 : i32
    %c0_i32_1 = arith.constant 0 : i32
    return %c0_i32, %c0_i32_0 : i32, i32
  }
  func.func @transform_10(%arg0: i32) -> (i32, i32) {
    %c0_i32 = arith.constant 0 : i32
    %c0_i32_0 = arith.constant 0 : i32
    %c0_i32_1 = arith.constant 0 : i32
    return %c0_i32, %c0_i32_0 : i32, i32
  }
  func.func @transform_11(%arg0: i32) -> (i32, i32) {
    %c0_i32 = arith.constant 0 : i32
    %c0_i32_0 = arith.constant 0 : i32
    %c0_i32_1 = arith.constant 0 : i32
    return %c0_i32, %c0_i32_0 : i32, i32
  }
  func.func @transform_12(%arg0: i32) -> (i32, i32) {
    %c0_i32 = arith.constant 0 : i32
    %c0_i32_0 = arith.constant 0 : i32
    %c0_i32_1 = arith.constant 0 : i32
    return %c0_i32, %c0_i32_0 : i32, i32
  }
  func.func @transform_13(%arg0: i32) -> (i32, i32) {
    %c0_i32 = arith.constant 0 : i32
    %c0_i32_0 = arith.constant 0 : i32
    %c0_i32_1 = arith.constant 0 : i32
    return %c0_i32, %c0_i32_0 : i32, i32
  }
  func.func @transform_14(%arg0: i32) -> (i32, i32) {
    %c0_i32 = arith.constant 0 : i32
    %c0_i32_0 = arith.constant 0 : i32
    %c0_i32_1 = arith.constant 0 : i32
    return %c0_i32, %c0_i32_0 : i32, i32
  }
  func.func @transform_15(%arg0: i32) -> (i32, i32) {
    %c0_i32 = arith.constant 0 : i32
    %c0_i32_0 = arith.constant 0 : i32
    return %arg0, %c0_i32 : i32, i32
  }
}

</mosaic_0001>

<bundles_post_ra>
// kernel: tpu_custom_call.1
= control target key start
LH: loop header
LB: loop body
LE: loop exit
PB: predicated region body
PF: predicated region fallthrough
CT: control target
= control target key end

     0   :  { %s1972_s0 = inlined_call_operand.hbm [shape: f32[10,16], index: 0, kind: input, shape index: {}]   ;;  %s1973_s1 = inlined_call_operand.vmem [shape: s32[10,1], index: 1, kind: input, shape index: {}]   ;;  %s1974_s2 = inlined_call_operand.hbm [shape: f32[16,64], index: 2, kind: input, shape index: {}]   ;;  %s1975_s3 = inlined_call_operand.vmem [shape: f32[1,64], index: 3, kind: input, shape index: {}]   ;;  %s1976_s4 = inlined_call_operand.vmem [shape: f32[64,64], index: 4, kind: input, shape index: {}]   ;;  %s1977_s5 = inlined_call_operand.vmem [shape: f32[1,64], index: 5, kind: input, shape index: {}]   ;;  %s1978_s6 = inlined_call_operand.vmem [shape: f32[64,32], index: 6, kind: input, shape index: {}]   ;;  %s1979_s7 = inlined_call_operand.vmem [shape: f32[1,32], index: 7, kind: input, shape index: {}]   ;;  %s1980_s8 = inlined_call_operand.vmem [shape: f32[32,64], index: 8, kind: input, shape index: {}]   ;;  %s1981_s9 = inlined_call_operand.vmem [shape: f32[3,64], index: 9, kind: input, shape index: {}]   ;;  %s1982_s10 = inlined_call_operand.vmem [shape: f32[1,64], index: 10, kind: input, shape index: {}]   ;;  %s1983_s11 = inlined_call_operand.vmem [shape: f32[64,64], index: 11, kind: input, shape index: {}]   ;;  %s1984_s12 = inlined_call_operand.vmem [shape: f32[1,64], index: 12, kind: input, shape index: {}]   ;;  %s1985_s13 = inlined_call_operand.vmem [shape: f32[64,4], index: 13, kind: input, shape index: {}]   ;;  %s1986_s14 = inlined_call_operand.vmem [shape: f32[1,4], index: 14, kind: input, shape index: {}]   ;;  %s1987_s15 = inlined_call_operand.vmem [shape: f32[10,4], index: 15, kind: output, shape index: {}]  }
   0x1   :  { %1994 = sst [smem:[#allocation9_spill]] %s1981_s9 }
   0x2   :  { %1995 = sst [smem:[#allocation10_spill]] %s1982_s10 }
   0x3   :  { %1996 = sst [smem:[#allocation11_spill]] %s1984_s12 }
   0x4   :  { %1997 = sst [smem:[#allocation12_spill]] %s1985_s13 }
   0x5   :  { %1998 = sst [smem:[#allocation13_spill]] %s1986_s14 }
   0x6   :  { %1999 = sst [smem:[#allocation14_spill]] %s1987_s15 }
   0x7   :  { %20 = vsyncpa [#allocation3], 0 }
   0x8   :  { %22 = vsyncpa [#allocation3 + $0x1], 0 }
   0x9   :  { %23 = vsyncpa [#allocation5], 0  ;;  %s1659_s18 = smov 0   ;;  %s1661_s19 = smov 0  }
   0xa   :  { %s1663_s20 = smov 0   ;;  %s1665_s21 = smov 0  }
   0xb LB: > { %s1678_s22 = sadd.s32 4294967295, %s1569_s21   ;;  %p49_p0 = scmp.ne.s32.totalorder %s1561_s19, %s1557_s18  ;;  %s1569_s21 = sphi %s1665_s21, %s2015_s21   ;;  %s1565_s20 = sphi %s1663_s20, %s2018_s20   ;;  %s1561_s19 = sphi %s1661_s19, %s2017_s19   ;;  %s1557_s18 = sphi %s1659_s18, %s2016_s18  }
   0xc   : > { %p1988_p1 = scmp.eq.s32.totalorder %s1678_s22, 0  ;;  %p1196_p2 = scmp.ge.s32.totalorder %s1569_s21, 1 }
   0xd   : > { %p385_p3 = scmp.lt.s32.totalorder %s1569_s21, 3  ;;  %s1571_s25 = smov [#allocation4]  }
   0xe   : > { %p1686_p4 = por %p1988_p1, %p49_p0  ;;  %s397_s26 = sshll.u32 %s1571_s25, 4  ;;  %s398_s26 = int_to_ptr.vmem [resolvable:$true] %s397_s26 }
   0xf   : > { %p1690_p5 = pnand %p1196_p2, %p385_p3  ;;  %s1703_s28 = sadd.s32 1, %s1569_s21  }
  0x10   : > { %s2000_s23 = scalar_select %p1686_p4, 1, 0 }
  0x11   : > { %s2001_s24 = scalar_select %p1690_p5, 1, 0 }
  0x12   : > { %p1421_p6 = pneg %p1690_p5  ;;  %2003 = sst [smem:[#allocation8_spill]] %s1703_s28 }
  0x13   : > { %s36_s29 = sadd.s32 1, %s1565_s20  ;;  %s33_s30 = ssub.s32 %s1569_s21, %s1703_s28 }
  0x14   : > { %p1698_p7 = pnand %p1421_p6, %p1988_p1  ;;  %s1473_s18 = scalar_lea.hbm %s1974_s2, 256 }
  0x15   : > { %p1474_p8 = scmp.ne.s32.totalorder %s1974_s2, %s1473_s18  ;;  %p1480_p12 = scmp.lt.u32.totalorder %s1473_s18, %s1974_s2 }
  0x16   : > { %p1475_p9 = pneg %p1698_p7 }
  0x18   : > { %p1476_p10 = pnand %p1475_p9, %p1474_p8 }
  0x1a   : > { %p1477_p11 = pneg %p1476_p10 }
  0x1c   : > { %p1482_p13 = pnand %p1480_p12, %p1477_p11 }
  0x1e   : > { %1485 = shalt.err (!%p1482_p13)
}
  0x1f   : > { %s1486_s10 = scalar_lea.vmem %s398_s26, 256  ;;  %p1494_p6 = scmp.lt.s32.totalorder %s398_s26, %s398_s26 }
  0x20   : > { %p1487_p0 = scmp.ne.s32.totalorder %s398_s26, %s1486_s10  ;;  %p1495_p1 = scmp.lt.s32.totalorder %s1486_s10, %s1486_s10 }
  0x22   : > { %p1489_p2 = pnand %p1487_p0, %p1475_p9  ;;  %p1496_p4 = por %p1495_p1, %p1494_p6 }
  0x24   : > { %p1490_p3 = pneg %p1489_p2 }
  0x26   : > { %p1497_p5 = pnand %p1496_p4, %p1490_p3 }
  0x28   : > { %1500 = shalt.err (!%p1497_p5)
}
  0x29   : > { %s1572_s15 = smov 128   ;;  %s1573_s12 = smov 8  }
  0x2a   : > { %1424 = dma.hbm_to_vmem [thread:$0]  (!%p1698_p7), %s1974_s2, 256, %s398_s26, [#allocation5], %s1572_s15, %s1572_s15, %s1573_s12  }
  0x2b   : > { %p34_p8 = scmp.eq.s32.totalorder %s33_s30, 0  ;;  %p43_p9 = scmp.ne.s32.totalorder %s1565_s20, %s1561_s19 }
  0x2c   : > { %p44_p1 = scmp.eq.s32.totalorder %s1569_s21, 0  ;;  %p1430_p4 = scmp.lt.s32.totalorder %s1569_s21, 2 }
  0x2d   : > { %s1729_s10 = scalar_select %p34_p8, %s1565_s20, %s36_s29  }
  0x2e   : > { %p45_p5 = por %p44_p1, %p43_p9  ;;  %s447_s17 = sand.u32 1, %s1565_s20  }
  0x2f   : > { %s1199_s18 = sshll.u32 %s447_s17, 3  ;;  %s1200_s25 = sshll.u32 %s1569_s21, 7 }
  0x30   : > { %s1736_s13 = scalar_lea.hbm %s1972_s0, %s1200_s25  ;;  %s451_s26 = scalar_lea.vmem [#allocation2], %s1199_s18 }
  0x31   : > { %s458_s27 = sshll.u32 %s451_s26, 4  ;;  %p1740_p7 = pnand %p1430_p4, %p45_p5  ;;  %s1738_s27 = int_to_ptr.vmem [resolvable:$true] %s458_s27 }
  0x32   : > { %s448_s21 = scalar_lea.sflag [#allocation3], %s447_s17  ;;  %s1501_s30 = scalar_lea.hbm %s1736_s13, 128 }
  0x33   : > { %p1502_p10 = scmp.ne.s32.totalorder %s1736_s13, %s1501_s30  ;;  %p1503_p11 = pneg %p1740_p7 }
  0x34   : > { %s1506_s15 = scalar_lea.hbm %s1972_s0, 256  ;;  %p1507_p0 = scmp.lt.u32.totalorder %s1736_s13, %s1972_s0 }
  0x35   : > { %p1504_p12 = pnand %p1503_p11, %p1502_p10  ;;  %p1508_p2 = scmp.lt.u32.totalorder %s1506_s15, %s1501_s30 }
  0x36   : > { %p1510_p6 = scmp.lt.u32.totalorder %s1501_s30, %s1736_s13 }
  0x37   : > { %p1505_p13 = pneg %p1504_p12  ;;  %p1509_p3 = por %p1508_p2, %p1507_p0 }
  0x39   : > { %p1511_p8 = por %p1510_p6, %p1509_p3 }
  0x3b   : > { %p1512_p9 = pnand %p1511_p8, %p1505_p13 }
  0x3d   : > { %1515 = shalt.err (!%p1512_p9)
}
  0x3e   : > { %s1516_s16 = scalar_lea.vmem %s1738_s27, 128  ;;  %s1574_s17 = smov [#allocation2]  }
  0x3f   : > { %p1517_p1 = scmp.ne.s32.totalorder %s1738_s27, %s1516_s16  ;;  %s1521_s18 = sshll.u32 %s1574_s17, 4  ;;  %s1522_s18 = int_to_ptr.vmem [resolvable:$false] %s1521_s18 }
  0x40   : > { %s1523_s25 = scalar_lea.vmem %s1522_s18, 256  ;;  %p1524_p10 = scmp.lt.s32.totalorder %s1738_s27, %s1522_s18 }
  0x41   : > { %p1519_p4 = pnand %p1517_p1, %p1503_p11  ;;  %p1525_p12 = scmp.lt.s32.totalorder %s1523_s25, %s1516_s16 }
  0x43   : > { %p1520_p5 = pneg %p1519_p4  ;;  %p1526_p0 = por %p1525_p12, %p1524_p10 }
  0x45   : > { %p1527_p2 = pnand %p1526_p0, %p1520_p5 }
  0x47   : > { %1530 = shalt.err (!%p1527_p2)
}
  0x48   : > { %1428 = dma.hbm_to_vmem [thread:$0]  (!%p1740_p7), %s1736_s13, 128, %s1738_s27, %s448_s21  }
  0x49   : > { %p2005_p13 = scmp.ne.s32.totalorder %s2001_s24, 0 }
  0x4a   : > { %s476_s26 = sand.u32 (!%p2005_p13), 1, %s1561_s19   ;;  %p2006_p11 = scmp.ne.s32.totalorder (!%p2005_p13), %s2000_s23, 0 }
  0x4b   : > { %474 = sbr.rel (%p2005_p13) target bundleno = 1385 (0x569), region = 80  ;;  %s1202_s30 = sshll.u32 (!%p2005_p13), %s476_s26, 3 }
  0x4c   : > { %s477_s9 = scalar_lea.sflag (!%p2005_p13), [#allocation3], %s476_s26  ;;  %s480_s28 = scalar_lea.vmem (!%p2005_p13), [#allocation2], %s1202_s30 }
  0x52   : > { %1548 = dma.done.wait (%p2006_p11), %s477_s9, 128  }
  0x53   : > { %1550 = vsyncadd (%p2006_p11), %s477_s9, 4294967168  ;;  %p2007_p3 = scmp.eq.s32.totalorder %s1678_s22, 0 }
  0x55   : > { %1552 = dma.done.wait (%p2007_p3), [#allocation5], 256   ;;  %p2008_p6 = pmov %p2007_p3 }
  0x56   : > { %v1575_v0 = vmov 0.0|0.0   ;;  %vm1576_vm0 = vmmov 0   ;;  %v1577_v1 = vmov 0.0   ;;  %v543_v2 = vld [vmem:[#allocation4] sm:$0xff]  ;;  %v544_v3 = vld [vmem:[#allocation4 + $0x8] sm:$0xff]  ;;  %v627_v5 = vld [vmem:[%s1976_s4] sm:$0xff] }
  0x57   : > { %1554 = vsyncadd (%p2008_p6), [#allocation5], 4294967040  ;;  %1358 = vmatprep.subr.bf16.mxu0 %v1575_v0  ;;  %1268 = vmatprep.mubr.msk.f32.mxu0 %vm1576_vm0, %v1577_v1  ;;  %v1359_v4 = vpack.c.bf16 %v544_v3, %v543_v2  ;;  %v628_v6 = vld [vmem:[%s1976_s4 + $0x8] sm:$0xff]  ;;  %v629_v7 = vld [vmem:[%s1976_s4 + $0x10] sm:$0xff]  ;;  %vm552_vm1 = vcmask 130048   ;;  %vm642_vm2 = vcmask 523264  }
  0x58   : > { %1361 = vmatprep.subr.bf16.mxu1 %v1575_v0  ;;  %1287 = vmatprep.mubr.msk.f32.mxu1 %vm1576_vm0, %v1577_v1  ;;  %v1362_v8 = vpack.c.bf16 %v628_v6, %v627_v5  ;;  %v630_v9 = vld [vmem:[%s1976_s4 + $0x18] sm:$0xff]  ;;  %v542_v10 = vld [vmem:[%s480_s28] sm:$0xff]  ;;  %v633_v15 = vld [vmem:[%s1976_s4 + $0x30] sm:$0xff]  ;;  %p534_p7 = scmp.lt.s32.totalorder %s1678_s22, 1  ;;  %v1578_v46 = vmov 0   ;;  %vm854_vm6 = vcmask 261120  }
  0x59   : > { %1360 = vmatpush3.bf16.msra.mxu0 %v1359_v4  ;;  %v1365_v11 = vpack.c.bf16 %v630_v9, %v629_v7  ;;  %v631_v12 = vld [vmem:[%s1976_s4 + $0x20] sm:$0xff]  ;;  %v632_v13 = vld [vmem:[%s1976_s4 + $0x28] sm:$0xff]  ;;  %v634_v16 = vld [vmem:[%s1976_s4 + $0x38] sm:$0xff]  ;;  %1471 = vset.pattern.permute.xlu0 %v1578_v46  ;;  %s2009_s23 = sld [smem:[#allocation12_spill]]  ;;  %s2010_s9 = sld [smem:[#allocation9_spill]]  ;;  %vm1106_vm10 = vcmask 31744  }
  0x5a   : > { %1363 = vmatpush3.bf16.msra.mxu1 %v1362_v8  ;;  %1373 = vmatprep.subr.bf16.mxu0 %v1575_v0  ;;  %v1368_v14 = vpack.c.bf16 %v632_v13, %v631_v12  ;;  %v1371_v17 = vpack.c.bf16 %v634_v16, %v633_v15  ;;  %v717_v18 = vld [vmem:[%s1978_s6] sm:$0xff]  ;;  %v718_v19 = vld [vmem:[%s1978_s6 + $0x8] sm:$0xff]  ;;  %v719_v20 = vld [vmem:[%s1978_s6 + $0x10] sm:$0xff]  ;;  %s2020_s22 = smov (!%p534_p7, %s1678_s22), 1  ;;  %v814_v13 = vlaneseq  ;;  %s2011_s24 = sld [smem:[#allocation10_spill]] }
  0x5b   : > { %1364 = vmatprep.subr.bf16.mxu1 %v1575_v0  ;;  %v1374_v21 = vpack.c.bf16 %v718_v19, %v717_v18  ;;  %v720_v22 = vld [vmem:[%s1978_s6 + $0x18] sm:$0xff]  ;;  %v721_v24 = vld [vmem:[%s1978_s6 + $0x20] sm:$0xff]  ;;  %v722_v25 = vld [vmem:[%s1978_s6 + $0x28] sm:$0xff]  ;;  %1472 = vset.pattern.permute.xlu1 %v1578_v46  ;;  %s1204_s17 = sshll.u32 %s2020_s22, 3  ;;  %s2012_s16 = sld [smem:[#allocation11_spill]] }
  0x5c   : > { %1269 = vmatmul.mubr.msk.f32.vlgmr.msra.gmra.mrb[0].mxu0 %vm552_vm1, %v542_v10  ;;  %v1377_v23 = vpack.c.bf16 %v720_v22, %v719_v20  ;;  %v1380_v26 = vpack.c.bf16 %v722_v25, %v721_v24  ;;  %v1206_v27 = vld [vmem:[%s1975_s3] ss:$0 sm:$0xff]  ;;  %v723_v32 = vld [vmem:[%s1978_s6 + $0x30] sm:$0xff]  ;;  %v724_v33 = vld [vmem:[%s1978_s6 + $0x38] sm:$0xff]  ;;  %s537_s26 = scalar_lea.vmem %s1973_s1, %s1204_s17  ;;  %s2014_s28 = sld [smem:[#allocation14_spill]] }
  0x5d   : > { %1306 = vmatprep.mubr.msk.f32.mxu0 %vm1576_vm0, %v1577_v1  ;;  %1375 = vmatpush3.bf16.msra.mxu0 %v1374_v21  ;;  %v1383_v34 = vpack.c.bf16 %v724_v33, %v723_v32  ;;  %v850_v35 = vld [vmem:[%s1980_s8] sm:$0xff]  ;;  %v851_v36 = vld [vmem:[%s1980_s8 + $0x8] sm:$0xff]  ;;  %v852_v43 = vld [vmem:[%s1980_s8 + $0x10] sm:$0xff] }
  0x5e   : > { %1366 = vmatpush3.bf16.msra.mxu1 %v1365_v11  ;;  %1376 = vmatprep.subr.bf16.mxu0 %v1575_v0  ;;  %v1386_v37 = vpack.c.bf16 %v851_v36, %v850_v35  ;;  %v1208_v38 = vld [vmem:[%s1977_s5] ss:$0 sm:$0xff]  ;;  %v853_v44 = vld [vmem:[%s1980_s8 + $0x18] sm:$0xff]  ;;  %v930_v52 = vld [vmem:[%s1983_s11 + $0x8] sm:$0xff] }
  0x5f   : > { %1367 = vmatprep.subr.bf16.mxu1 %v1575_v0  ;;  %v1389_v45 = vpack.c.bf16 %v853_v44, %v852_v43  ;;  %v805_v47 = vld [vmem:[%s537_s26] sm:$0xff]  ;;  %v931_v54 = vld [vmem:[%s1983_s11 + $0x10] sm:$0xff]  ;;  %v932_v55 = vld [vmem:[%s1983_s11 + $0x18] sm:$0xff]  ;;  %s2013_s26 = sld [smem:[#allocation13_spill]] }
  0x60   : > { %vm808_vm3 = vcmp.eq.s32.totalorder %v805_v47, 0  ;;  %vm826_vm4 = vcmp.eq.s32.totalorder %v805_v47, 1  ;;  %vm838_vm5 = vcmp.eq.s32.totalorder %v805_v47, 2  ;;  %v929_v51 = vld [vmem:[%s1983_s11] sm:$0xff]  ;;  %v1395_v56 = vpack.c.bf16 %v932_v55, %v931_v54  ;;  %v934_v58 = vld [vmem:[%s1983_s11 + $0x28] sm:$0xff]  ;;  %v935_v2 = vld [vmem:[%s1983_s11 + $0x30] sm:$0xff] }
  0x61   : > { %1378 = vmatpush3.bf16.msra.mxu0 %v1377_v23  ;;  %v809_v48 = vsel %vm808_vm3, 1, %v1578_v46  ;;  %v839_v49 = vsel %vm838_vm5, 1, %v1578_v46  ;;  %v827_v50 = vsel %vm826_vm4, 1, %v1578_v46  ;;  %v1392_v53 = vpack.c.bf16 %v930_v52, %v929_v51  ;;  %v933_v57 = vld [vmem:[%s1983_s11 + $0x20] sm:$0xff]  ;;  %v936_v3 = vld [vmem:[%s1983_s11 + $0x38] sm:$0xff]  ;;  %v1019_v6 = vld [vmem:[%s2009_s23 + $0x8] sm:$0xff] }
  0x62   : > { %1369 = vmatpush3.bf16.msra.mxu1 %v1368_v14  ;;  %1379 = vmatprep.subr.bf16.mxu0 %v1575_v0  ;;  %v1398_v59 = vpack.c.bf16 %v934_v58, %v933_v57  ;;  %v1210_v60 = vld [vmem:[%s1979_s7] ss:$0 sm:$0xff]  ;;  %v1401_v4 = vpack.c.bf16 %v936_v3, %v935_v2  ;;  %v1021_v8 = vld [vmem:[%s2009_s23 + $0x18] sm:$0xff]  ;;  %v1023_v11 = vld [vmem:[%s2009_s23 + $0x28] sm:$0xff]  ;;  %v815_v14 = vshrl.u32 %v814_v13, 7  ;;  %s541_s13 = scalar_lea.vmem %s2014_s28, %s1204_s17 }
  0x63   : > { %1370 = vmatprep.subr.bf16.mxu1 %v1575_v0  ;;  %811 = vperm.xlu0 %1471, %v809_v48   ;;  %v1018_v5 = vld [vmem:[%s2009_s23] sm:$0xff]  ;;  %v1024_v35 = vld [vmem:[%s2009_s23 + $0x30] sm:$0xff]  ;;  %v1025_v36 = vld [vmem:[%s2009_s23 + $0x38] sm:$0xff] }
  0x64   : > { %841 = vperm.xlu1 %1472, %v839_v49   ;;  %v1404_v7 = vpack.c.bf16 %v1019_v6, %v1018_v5  ;;  %v1022_v10 = vld [vmem:[%s2009_s23 + $0x20] sm:$0xff]  ;;  %v816_v15 = vsub.s32 0, %v815_v14  ;;  %v834_v19 = vsub.s32 1, %v815_v14  ;;  %v846_v24 = vsub.s32 2, %v815_v14 }
  0x65   : > { %1381 = vmatpush3.bf16.msra.mxu0 %v1380_v26  ;;  %v1410_v12 = vpack.c.bf16 %v1023_v11, %v1022_v10  ;;  %v1212_v21 = vld [vmem:[%s2011_s24] ss:$0 sm:$0xff] }
  0x66   : > { %1372 = vmatpush3.bf16.msra.mxu1 %v1371_v17  ;;  %1382 = vmatprep.subr.bf16.mxu0 %v1575_v0  ;;  %v806_v17 = vld [vmem:[%s2010_s9] sm:$0x7] }
  0x67   : > { %1385 = vmatprep.subr.bf16.mxu1 %v1575_v0  ;;  %829 = vperm.xlu0 %1471, %v827_v50   ;;  %v817_v18 = vrot.slane %v806_v17, %v816_v15  ;;  %v835_v23 = vrot.slane %v806_v17, %v834_v19  ;;  %v1216_v43 = vld [vmem:[%s2013_s26] ss:$0 sm:$0xff] }
  0x69   : > { %1384 = vmatpush3.bf16.msra.mxu0 %v1383_v34 }
  0x6a   : > { %1391 = vmatprep.subr.bf16.mxu0 %v1575_v0 }
  0xe2   : > { %v812_v16 = vpop.permute.xlu0 %811 }
  0xe3   : > { %vm813_vm7 = vcmp.eq.s32.totalorder %v812_v16, 1 }
  0xe4   : > { %v818_v22 = vsel %vm813_vm7, %v817_v18, 0.0 }
  0xe5   : > { %v825_v25 = vadd.f32 %v1212_v21, %v818_v22 }
  0xe6   : > { %v830_v20 = vpop.permute.xlu0 %829 }
  0xe7   : > { %vm831_vm8 = vcmp.eq.s32.totalorder %v830_v20, 1 }
  0xe8   : > { %v836_v26 = vsel %vm831_vm8, %v835_v23, 0.0 }
 0x12f   : > { %v622_v28 = vpop.f32.mrb[0].mxu0 }
 0x130   : > { %v623_v29 = vadd.f32 %v1206_v27, %v622_v28  ;;  %v1270_v30 = vpop.f32.mrb[1].mxu0  ;;  %v847_v27 = vrot.slane %v806_v17, %v846_v24  ;;  %v837_v28 = vadd.f32 %v836_v26, %v825_v25 }
 0x132   : > { %v626_v31 = vmax.f32 %v623_v29, 0.0 }
 0x134   : > { %1288 = vmatmul.mubr.msk.f32.vlgmr.msra.gmra.mrb[0].mxu1 %vm642_vm2, %v626_v31 }
 0x135   : > { %1317 = vmatprep.mubr.msk.f32.mxu1 %vm1576_vm0, %v1577_v1  ;;  %1387 = vmatpush3.bf16.msra.mxu1 %v1386_v37  ;;  %v1413_v37 = vpack.c.bf16 %v1025_v36, %v1024_v35 }
 0x136   : > { %1388 = vmatprep.subr.bf16.mxu1 %v1575_v0 }
 0x139   : > { %1390 = vmatpush3.bf16.msra.mxu1 %v1389_v45 }
 0x13a   : > { %1403 = vmatprep.subr.bf16.mxu1 %v1575_v0 }
 0x207   : > { %v712_v39 = vpop.f32.mrb[0].mxu1 }
 0x208   : > { %v713_v40 = vadd.f32 %v1208_v38, %v712_v39  ;;  %v1289_v41 = vpop.f32.mrb[1].mxu1  ;;  %v1214_v38 = vld [vmem:[%s2012_s16] ss:$0 sm:$0xff] }
 0x20a   : > { %v716_v42 = vmax.f32 %v713_v40, 0.0 }
 0x20c   : > { %1307 = vmatmul.mubr.msk.f32.vlgmr.msra.gmra.mrb[2].mxu0 %vm642_vm2, %v716_v42 }
 0x20d   : > { %1336 = vmatprep.mubr.msk.f32.mxu0 %vm1576_vm0, %v1577_v1  ;;  %1393 = vmatpush3.bf16.msra.mxu0 %v1392_v53 }
 0x20e   : > { %1394 = vmatprep.subr.bf16.mxu0 %v1575_v0 }
 0x211   : > { %1396 = vmatpush3.bf16.msra.mxu0 %v1395_v56 }
 0x212   : > { %1397 = vmatprep.subr.bf16.mxu0 %v1575_v0 }
 0x215   : > { %1399 = vmatpush3.bf16.msra.mxu0 %v1398_v59 }
 0x216   : > { %1400 = vmatprep.subr.bf16.mxu0 %v1575_v0 }
 0x219   : > { %1402 = vmatpush3.bf16.msra.mxu0 %v1401_v4 }
 0x2df   : > { %v801_v61 = vpop.f32.mrb[2].mxu0 }
 0x2e0   : > { %v802_v62 = vadd.f32 %v1210_v60, %v801_v61  ;;  %v1308_v63 = vpop.f32.mrb[3].mxu0 }
 0x2e2   : > { %1318 = vmatmul.mubr.msk.f32.vlgmr.msra.gmra.mrb[2].mxu1 %vm854_vm6, %v802_v62 }
 0x2e3   : > { %1355 = vmatprep.mubr.msk.f32.mxu1 %vm1576_vm0, %v1577_v1  ;;  %v1020_v1 = vld [vmem:[%s2009_s23 + $0x10] sm:$0xff]  ;;  %1405 = vmatpush3.bf16.msra.mxu1 %v1404_v7 }
 0x2e4   : > { %v1407_v9 = vpack.c.bf16 %v1021_v8, %v1020_v1  ;;  %1406 = vmatprep.subr.bf16.mxu1 %v1575_v0 }
 0x2e7   : > { %1408 = vmatpush3.bf16.msra.mxu1 %v1407_v9 }
 0x2e8   : > { %1409 = vmatprep.subr.bf16.mxu1 %v1575_v0 }
 0x2eb   : > { %1411 = vmatpush3.bf16.msra.mxu1 %v1410_v12 }
 0x2ec   : > { %1412 = vmatprep.subr.bf16.mxu1 %v1575_v0  ;;  %v842_v0 = vpop.permute.xlu1 %841 }
 0x2ed   : > { %vm843_vm9 = vcmp.eq.s32.totalorder %v842_v0, 1 }
 0x2ee   : > { %v848_v29 = vsel %vm843_vm9, %v847_v27, 0.0 }
 0x2ef   : > { %v849_v30 = vadd.f32 %v848_v29, %v837_v28  ;;  %1414 = vmatpush3.bf16.msra.mxu1 %v1413_v37 }
 0x3b5   : > { %v924_v31 = vpop.f32.mrb[2].mxu1 }
 0x3b6   : > { %v925_v32 = vadd.f32 %v924_v31, %v849_v30  ;;  %v1319_v33 = vpop.f32.mrb[3].mxu1 }
 0x3b8   : > { %v928_v34 = vmax.f32 %v925_v32, 0.0 }
 0x3ba   : > { %1337 = vmatmul.mubr.msk.f32.vlgmr.msra.gmra.mrb[4].mxu0 %vm642_vm2, %v928_v34 }
 0x48d   : > { %v1013_v39 = vpop.f32.mrb[4].mxu0 }
 0x48e   : > { %v1014_v40 = vadd.f32 %v1214_v38, %v1013_v39  ;;  %v1338_v41 = vpop.f32.mrb[5].mxu0 }
 0x490   : > { %v1017_v42 = vmax.f32 %v1014_v40, 0.0 }
 0x492   : > { %1356 = vmatmul.mubr.msk.f32.vlgmr.msra.gmra.mrb[4].mxu1 %vm642_vm2, %v1017_v42 }
 0x565   : > { %v1102_v44 = vpop.f32.mrb[4].mxu1 }
 0x566   : > { %v1103_v45 = vadd.f32 %v1216_v43, %v1102_v44  ;;  %v1357_v46 = vpop.f32.mrb[5].mxu1 }
 0x568   : > { %1107 = vst.msk [vmem:[%s541_s13] sm:$0xff] %vm1106_vm10, %v1103_v45 }
 0x569 PF: > { %s2015_s21 = sld [smem:[#allocation8_spill]]  ;;  %s2016_s18 = smov %s1561_s19 }
 0x56a   : > { %s2017_s19 = smov %s1565_s20  ;;  %s2018_s20 = smov %s1729_s10 }
 0x56f   : > { %p26_p8 = scmp.ge.s32.totalorder %s2015_s21, 4  }
 0x571   :  { %28 = sbr.rel (!%p26_p8) target bundleno = 11 (0xb), region = 127 }
 0x578   :  { %1127 = vsyncpa [#allocation3], 1 }
 0x579   :  { %1129 = vsyncpa [#allocation3 + $0x1], 1 }
 0x57a   :  { %1130 = vsyncpa [#allocation5], 1 }

</bundles_post_ra>
